<compile_context>
chip_gen: v7x
topology: tpu7x:2x2x1
jax: 0.10.0
libtpu: 0.0.40
codegen_flags: <defaults>
</compile_context>

<pallas_src>
import functools

import jax
import jax.numpy as jnp
from jax.experimental import pallas as pl
from jax.experimental.pallas import tpu as pltpu

LANE = 128


def _round_up(x: int, m: int) -> int:
    return ((x + m - 1) // m) * m


def _mlp_kernel(*refs, num_layers: int, sigmoid_output: bool):
    """refs = (x_ref, w0, b0, ..., w_{L-1}, b_{L-1}, o_ref).

    Matmuls run in the weights' dtype (bf16) on the MXU with f32 accumulation;
    bias-add / ReLU / sigmoid stay in f32 (VPU / EUP).
    """
    x_ref = refs[0]
    o_ref = refs[-1]
    params = refs[1:-1]

    h = x_ref[...]
    for i in range(num_layers):
        w_ref = params[2 * i]
        b_ref = params[2 * i + 1]
        acc = jnp.dot(h.astype(w_ref.dtype), w_ref[...],
                      preferred_element_type=jnp.float32)
        acc = acc + b_ref[...].astype(jnp.float32)
        h = jnp.maximum(acc, 0.0) if i < num_layers - 1 else acc
    if sigmoid_output:
        h = jax.nn.sigmoid(h)
    o_ref[...] = h.astype(o_ref.dtype)


def _select_tile_m(n, vmem_need_fn, budget):
    """Pick tile_m from {128, 256, 512, 1024}: minimize batch-padding waste,
    then prefer >= 2 grid steps when n > 128 (two TensorCores), then prefer
    the larger tile (fewer per-step overheads)."""
    best_key, best = None, None
    for t in (128, 256, 512, 1024):
        if vmem_need_fn(t) > budget and best is not None:
            break
        n_pad = _round_up(max(n, 1), t)
        steps = n_pad // t
        key = (n_pad, 1 if (n > 128 and steps < 2) else 0, -t)
        if best_key is None or key < best_key:
            best_key, best = key, (t, n_pad)
    return best


class PallasMLP:
    """Pallas TPU port of segment_anything's MaskDecoder MLP (fused forward).

    `weights[i]` has shape (in_dim_i, out_dim_i) (i.e. transposed vs. the
    PyTorch nn.Linear layout), `biases[i]` has shape (out_dim_i,).  Parameters
    are padded / cast exactly once here (not per call).
    """

    def __init__(self, weights, biases, *, sigmoid_output=False,
                 compute_dtype=jnp.bfloat16):
        num_layers = len(weights)
        assert num_layers == len(biases) and num_layers >= 1
        in_dims = [w.shape[0] for w in weights]
        out_dims = [w.shape[1] for w in weights]
        self.num_layers = num_layers
        self.sigmoid_output = bool(sigmoid_output)
        self.input_dim = in_dims[0]
        self.output_dim = out_dims[-1]
        self.true_dims = tuple([in_dims[0]] + out_dims)

        # Padded widths: input dim stays (avoids padding x per call); hidden
        # dims -> multiples of 128 (lane-dense MXU); output dim padded only if
        # it is already wide (avoid 8x write amplification for tiny heads).
        pad_dims = [self.input_dim]
        for d in out_dims[:-1]:
            pad_dims.append(_round_up(d, LANE))
        pad_dims.append(self.output_dim if self.output_dim < LANE
                        else _round_up(self.output_dim, LANE))
        self.pad_dims = tuple(pad_dims)

        w_p, b_p = [], []
        for i, (w, b) in enumerate(zip(weights, biases)):
            ip, op = pad_dims[i], pad_dims[i + 1]
            w = jnp.asarray(w)
            b = jnp.reshape(jnp.asarray(b), (1, -1)).astype(jnp.float32)
            w = jnp.pad(w, ((0, ip - w.shape[0]), (0, op - w.shape[1])))
            b = jnp.pad(b, ((0, 0), (0, op - b.shape[1])))
            w_p.append(w.astype(compute_dtype))   # bf16 MXU operands
            b_p.append(b)                         # f32 bias (VPU add)
        self.weights = tuple(w_p)
        self.biases = tuple(b_p)

    # ------------------------------------------------------------- forward --
    def __call__(self, x):
        n, d = x.shape
        assert d == self.input_dim, (d, self.input_dim)
        out_last = self.pad_dims[-1]
        out_dtype = x.dtype

        param_bytes = (sum(w.size * w.dtype.itemsize for w in self.weights)
                       + sum(b.size * b.dtype.itemsize for b in self.biases))
        widest = max(self.pad_dims)

        def vmem_need(tile_m):
            x_bytes = 2 * tile_m * self.input_dim * x.dtype.itemsize  # 2x-buffered in tile
            o_bytes = 2 * tile_m * out_last * out_dtype.itemsize      # 2x-buffered out tile
            act_bytes = 2 * tile_m * widest * 4                       # f32 intermediates
            return x_bytes + o_bytes + param_bytes + act_bytes

        budget = 40 << 20  # keep well under v7x's 64 MiB physical VMEM
        tile_m, n_pad = _select_tile_m(n, vmem_need, budget)
        grid = (n_pad // tile_m,)

        # Only batch padding (feature dim untouched); skipped entirely when
        # N already matches the tile.
        x_in = x if n_pad == n else jnp.pad(x, ((0, n_pad - n), (0, 0)))

        kernel = functools.partial(_mlp_kernel, num_layers=self.num_layers,
                                   sigmoid_output=self.sigmoid_output)

        # True (unpadded) cost -- padded numbers over-report work 4-8x.
        dims = self.true_dims
        flops = 2 * n * sum(dims[i] * dims[i + 1] for i in range(self.num_layers))
        transcendentals = n * self.output_dim if self.sigmoid_output else 0
        w_itemsize = self.weights[0].dtype.itemsize
        bytes_accessed = (n * self.input_dim * x.dtype.itemsize
                          + sum(dims[i] * dims[i + 1] * w_itemsize
                                for i in range(self.num_layers))
                          + sum(dims[i + 1] * 4 for i in range(self.num_layers))
                          + n * self.output_dim * out_dtype.itemsize)
        cost = pl.CostEstimate(flops=flops, transcendentals=transcendentals,
                               bytes_accessed=bytes_accessed)
        vmem_limit = int(min(48 << 20, vmem_need(tile_m) + (8 << 20)))

        def param_spec(shape, single_buffer):
            idx = lambda i: (0,) * len(shape)
            if single_buffer:
                # Grid-invariant block: one VMEM buffer is enough.
                return pl.BlockSpec(shape, idx, pipeline_mode=pl.Buffered(1))
            return pl.BlockSpec(shape, idx)

        def run(single_buffer_params):
            in_specs = [pl.BlockSpec((tile_m, self.input_dim), lambda i: (i, 0))]
            args = [x_in]
            for w, b in zip(self.weights, self.biases):
                in_specs.append(param_spec(w.shape, single_buffer_params))
                in_specs.append(param_spec(b.shape, single_buffer_params))
                args.append(w)
                args.append(b)
            out_spec = pl.BlockSpec((tile_m, out_last), lambda i: (i, 0))
            return pl.pallas_call(
                kernel,
                out_shape=jax.ShapeDtypeStruct((n_pad, out_last), out_dtype),
                grid_spec=pltpu.PrefetchScalarGridSpec(
                    num_scalar_prefetch=0,
                    grid=grid,
                    in_specs=in_specs,
                    out_specs=out_spec,
                ),
                compiler_params=pltpu.CompilerParams(
                    dimension_semantics=("parallel",),
                    vmem_limit_bytes=vmem_limit,
                ),
                cost_estimate=cost,
            )(*args)

        try:
            out = run(single_buffer_params=True)
        except Exception:
            # Fallback for jax versions without BlockSpec.pipeline_mode /
            # single-buffering support: default double-buffered param blocks.
            out = run(single_buffer_params=False)

        if n_pad != n or out_last != self.output_dim:
            out = out[:n, :self.output_dim]
        return out


# ----------------------------------------------------------------------------
# Parameter init + references (for the self-test below)
# ----------------------------------------------------------------------------
def init_mlp_params(key, input_dim, hidden_dim, output_dim, num_layers):
    """Deterministic synthetic init mirroring the nn.ModuleList layer shapes.
    Weights are stored transposed (in_dim, out_dim) vs. PyTorch's (out, in)."""
    h = [hidden_dim] * (num_layers - 1)
    in_dims = [input_dim] + h
    out_dims = h + [output_dim]
    weights, biases = [], []
    for n_in, n_out in zip(in_dims, out_dims):
        key, wk, bk = jax.random.split(key, 3)
        w = jax.random.normal(wk, (n_in, n_out), jnp.float32) / jnp.sqrt(n_in)
        b = jax.random.normal(bk, (n_out,), jnp.float32) * 0.01
        weights.append(w)
        biases.append(b)
    return weights, biases


def mlp_reference_mixed(x, weights, biases, sigmoid_output,
                        compute_dtype=jnp.bfloat16):
    """Pure-JAX reference with the same mixed precision as the kernel."""
    h = x
    L = len(weights)
    for i, (w, b) in enumerate(zip(weights, biases)):
        h = jnp.dot(h.astype(compute_dtype), w.astype(compute_dtype),
                    preferred_element_type=jnp.float32) + jnp.reshape(b, (1, -1))
        if i < L - 1:
            h = jnp.maximum(h, 0.0)
    if sigmoid_output:
        h = jax.nn.sigmoid(h)
    return h.astype(x.dtype)


def mlp_reference_f32(x, weights, biases, sigmoid_output):
    h = x
    L = len(weights)
    for i, (w, b) in enumerate(zip(weights, biases)):
        h = h @ w + jnp.reshape(b, (1, -1))
        if i < L - 1:
            h = jnp.maximum(h, 0.0)
    if sigmoid_output:
        h = jax.nn.sigmoid(h)
    return h


if __name__ == "__main__":
    # Shapes consistent with the module, e.g. MLP(input_dim=32, hidden_dim=64,
    # output_dim=16, num_layers=3, sigmoid_output=True)
    input_dim, hidden_dim, output_dim, num_layers = 32, 64, 16, 3
    sigmoid_output = True
    N = 16  # not a multiple of the tile -> exercises batch padding

    key = jax.random.PRNGKey(0)
    key, xk = jax.random.split(key)
    x = jax.random.normal(xk, (N, input_dim), jnp.float32)
    weights, biases = init_mlp_params(key, input_dim, hidden_dim, output_dim,
                                      num_layers)

    mlp = PallasMLP(weights, biases, sigmoid_output=sigmoid_output)
    out = jax.block_until_ready(mlp(x))

    assert out.shape == (N, output_dim)

    # Matches the same mixed-precision (bf16 MXU, f32 accumulate) computation.
    ref_mixed = mlp_reference_mixed(x, weights, biases, sigmoid_output)
    assert jnp.allclose(out, ref_mixed, atol=2e-3, rtol=2e-3), \
        "mismatch vs mixed-precision reference"

    # Semantic sanity check vs. the full-f32 reference (bf16 rounding only).
    ref_f32 = mlp_reference_f32(x, weights, biases, sigmoid_output)
    assert jnp.allclose(out, ref_f32, atol=5e-2, rtol=5e-2), \
        "mismatch vs f32 reference"

    print("KERNEL_OK")
</pallas_src>

<mosaic_0001>
module attributes {stable_mosaic.version = 11 : i64} {
  func.func @_mlp_kernel(%arg0: i32, %arg1: memref<128x32xf32, #tpu.memory_space<vmem>>, %arg2: memref<32x128xbf16, #tpu.memory_space<vmem>>, %arg3: memref<1x128xf32, #tpu.memory_space<vmem>>, %arg4: memref<128x128xbf16, #tpu.memory_space<vmem>>, %arg5: memref<1x128xf32, #tpu.memory_space<vmem>>, %arg6: memref<128x16xbf16, #tpu.memory_space<vmem>>, %arg7: memref<1x16xf32, #tpu.memory_space<vmem>>, %arg8: memref<128x16xf32, #tpu.memory_space<vmem>>) attributes {dimension_semantics = [#tpu.dimension_semantics<parallel>], iteration_bounds = array<i64: 1>, scalar_prefetch = 0 : i64, scratch_operands = 0 : i64, tpu.core_type = #tpu.core_type<tc>, window_params = [{transform_indices = @transform_0, window_bounds = array<i64: 128, 32>}, {pipeline_mode = #tpu.pipeline_mode<synchronous>, transform_indices = @transform_1, window_bounds = array<i64: 32, 128>}, {pipeline_mode = #tpu.pipeline_mode<synchronous>, transform_indices = @transform_2, window_bounds = array<i64: 1, 128>}, {pipeline_mode = #tpu.pipeline_mode<synchronous>, transform_indices = @transform_3, window_bounds = array<i64: 128, 128>}, {pipeline_mode = #tpu.pipeline_mode<synchronous>, transform_indices = @transform_4, window_bounds = array<i64: 1, 128>}, {pipeline_mode = #tpu.pipeline_mode<synchronous>, transform_indices = @transform_5, window_bounds = array<i64: 128, 16>}, {pipeline_mode = #tpu.pipeline_mode<synchronous>, transform_indices = @transform_6, window_bounds = array<i64: 1, 16>}, {transform_indices = @transform_7, window_bounds = array<i64: 128, 16>}]} {
    %c0 = arith.constant 0 : index
    %c0_0 = arith.constant 0 : index
    %0 = vector.load %arg1[%c0, %c0_0] : memref<128x32xf32, #tpu.memory_space<vmem>>, vector<128x32xf32>
    %1 = arith.truncf %0 : vector<128x32xf32> to vector<128x32xbf16>
    %c0_1 = arith.constant 0 : index
    %c0_2 = arith.constant 0 : index
    %2 = vector.load %arg2[%c0_1, %c0_2] : memref<32x128xbf16, #tpu.memory_space<vmem>>, vector<32x128xbf16>
    %cst = arith.constant dense<0.000000e+00> : vector<128x128xf32>
    %3 = tpu.matmul %1, %2, %cst {dimension_numbers = #tpu.dot_dimension_numbers<[1], [0], [0], [1], [0, 0, 1, 1], [], []>} : vector<128x32xbf16>, vector<32x128xbf16>, vector<128x128xf32> -> vector<128x128xf32>
    %c0_3 = arith.constant 0 : index
    %c0_4 = arith.constant 0 : index
    %4 = vector.load %arg3[%c0_3, %c0_4] : memref<1x128xf32, #tpu.memory_space<vmem>>, vector<1x128xf32>
    %5 = vector.broadcast %4 : vector<1x128xf32> to vector<128x128xf32>
    %6 = arith.addf %3, %5 : vector<128x128xf32>
    %cst_5 = arith.constant 0.000000e+00 : f32
    %7 = vector.broadcast %cst_5 : f32 to vector<128x128xf32>
    %8 = arith.maximumf %6, %7 : vector<128x128xf32>
    %9 = arith.truncf %8 : vector<128x128xf32> to vector<128x128xbf16>
    %c0_6 = arith.constant 0 : index
    %c0_7 = arith.constant 0 : index
    %10 = vector.load %arg4[%c0_6, %c0_7] : memref<128x128xbf16, #tpu.memory_space<vmem>>, vector<128x128xbf16>
    %cst_8 = arith.constant dense<0.000000e+00> : vector<128x128xf32>
    %11 = tpu.matmul %9, %10, %cst_8 {dimension_numbers = #tpu.dot_dimension_numbers<[1], [0], [0], [1], [0, 0, 1, 1], [], []>} : vector<128x128xbf16>, vector<128x128xbf16>, vector<128x128xf32> -> vector<128x128xf32>
    %c0_9 = arith.constant 0 : index
    %c0_10 = arith.constant 0 : index
    %12 = vector.load %arg5[%c0_9, %c0_10] : memref<1x128xf32, #tpu.memory_space<vmem>>, vector<1x128xf32>
    %13 = vector.broadcast %12 : vector<1x128xf32> to vector<128x128xf32>
    %14 = arith.addf %11, %13 : vector<128x128xf32>
    %cst_11 = arith.constant 0.000000e+00 : f32
    %15 = vector.broadcast %cst_11 : f32 to vector<128x128xf32>
    %16 = arith.maximumf %14, %15 : vector<128x128xf32>
    %17 = arith.truncf %16 : vector<128x128xf32> to vector<128x128xbf16>
    %c0_12 = arith.constant 0 : index
    %c0_13 = arith.constant 0 : index
    %18 = vector.load %arg6[%c0_12, %c0_13] : memref<128x16xbf16, #tpu.memory_space<vmem>>, vector<128x16xbf16>
    %cst_14 = arith.constant dense<0.000000e+00> : vector<128x16xf32>
    %19 = tpu.matmul %17, %18, %cst_14 {dimension_numbers = #tpu.dot_dimension_numbers<[1], [0], [0], [1], [0, 0, 1, 1], [], []>} : vector<128x128xbf16>, vector<128x16xbf16>, vector<128x16xf32> -> vector<128x16xf32>
    %c0_15 = arith.constant 0 : index
    %c0_16 = arith.constant 0 : index
    %20 = vector.load %arg7[%c0_15, %c0_16] : memref<1x16xf32, #tpu.memory_space<vmem>>, vector<1x16xf32>
    %21 = vector.broadcast %20 : vector<1x16xf32> to vector<128x16xf32>
    %22 = arith.addf %19, %21 : vector<128x16xf32>
    %23 = arith.negf %22 : vector<128x16xf32>
    %24 = math.exp %23 : vector<128x16xf32>
    %cst_17 = arith.constant 1.000000e+00 : f32
    %25 = vector.broadcast %cst_17 : f32 to vector<128x16xf32>
    %26 = arith.addf %25, %24 : vector<128x16xf32>
    %27 = arith.divf %25, %26 : vector<128x16xf32>
    %c0_18 = arith.constant 0 : index
    %c0_19 = arith.constant 0 : index
    %28 = vector.load %arg8[%c0_18, %c0_19] : memref<128x16xf32, #tpu.memory_space<vmem>>, vector<128x16xf32>
    tpu.vector_store %arg8[%c0_18, %c0_19], %27 {strides = array<i32>} : memref<128x16xf32, #tpu.memory_space<vmem>>, vector<128x16xf32>,
    return
  }
  func.func @transform_0(%arg0: i32) -> (i32, i32) {
    %c0_i32 = arith.constant 0 : i32
    %c0_i32_0 = arith.constant 0 : i32
    return %arg0, %c0_i32 : i32, i32
  }
  func.func @transform_1(%arg0: i32) -> (i32, i32) {
    %c0_i32 = arith.constant 0 : i32
    %c0_i32_0 = arith.constant 0 : i32
    %c0_i32_1 = arith.constant 0 : i32
    return %c0_i32, %c0_i32_0 : i32, i32
  }
  func.func @transform_2(%arg0: i32) -> (i32, i32) {
    %c0_i32 = arith.constant 0 : i32
    %c0_i32_0 = arith.constant 0 : i32
    %c0_i32_1 = arith.constant 0 : i32
    return %c0_i32, %c0_i32_0 : i32, i32
  }
  func.func @transform_3(%arg0: i32) -> (i32, i32) {
    %c0_i32 = arith.constant 0 : i32
    %c0_i32_0 = arith.constant 0 : i32
    %c0_i32_1 = arith.constant 0 : i32
    return %c0_i32, %c0_i32_0 : i32, i32
  }
  func.func @transform_4(%arg0: i32) -> (i32, i32) {
    %c0_i32 = arith.constant 0 : i32
    %c0_i32_0 = arith.constant 0 : i32
    %c0_i32_1 = arith.constant 0 : i32
    return %c0_i32, %c0_i32_0 : i32, i32
  }
  func.func @transform_5(%arg0: i32) -> (i32, i32) {
    %c0_i32 = arith.constant 0 : i32
    %c0_i32_0 = arith.constant 0 : i32
    %c0_i32_1 = arith.constant 0 : i32
    return %c0_i32, %c0_i32_0 : i32, i32
  }
  func.func @transform_6(%arg0: i32) -> (i32, i32) {
    %c0_i32 = arith.constant 0 : i32
    %c0_i32_0 = arith.constant 0 : i32
    %c0_i32_1 = arith.constant 0 : i32
    return %c0_i32, %c0_i32_0 : i32, i32
  }
  func.func @transform_7(%arg0: i32) -> (i32, i32) {
    %c0_i32 = arith.constant 0 : i32
    %c0_i32_0 = arith.constant 0 : i32
    return %arg0, %c0_i32 : i32, i32
  }
}

module attributes {stable_mosaic.version = 11 : i64} {
  func.func @_mlp_kernel(%arg0: i32, %arg1: memref<128x32xf32, #tpu.memory_space<vmem>>, %arg2: memref<32x128xbf16, #tpu.memory_space<vmem>>, %arg3: memref<1x128xf32, #tpu.memory_space<vmem>>, %arg4: memref<128x128xbf16, #tpu.memory_space<vmem>>, %arg5: memref<1x128xf32, #tpu.memory_space<vmem>>, %arg6: memref<128x16xbf16, #tpu.memory_space<vmem>>, %arg7: memref<1x16xf32, #tpu.memory_space<vmem>>, %arg8: memref<128x16xf32, #tpu.memory_space<vmem>>) attributes {dimension_semantics = [#tpu.dimension_semantics<parallel>], iteration_bounds = array<i64: 1>, scalar_prefetch = 0 : i64, scratch_operands = 0 : i64, tpu.core_type = #tpu.core_type<tc>, window_params = [{transform_indices = @transform_0, window_bounds = array<i64: 128, 32>}, {pipeline_mode = #tpu.pipeline_mode<synchronous>, transform_indices = @transform_1, window_bounds = array<i64: 32, 128>}, {pipeline_mode = #tpu.pipeline_mode<synchronous>, transform_indices = @transform_2, window_bounds = array<i64: 1, 128>}, {pipeline_mode = #tpu.pipeline_mode<synchronous>, transform_indices = @transform_3, window_bounds = array<i64: 128, 128>}, {pipeline_mode = #tpu.pipeline_mode<synchronous>, transform_indices = @transform_4, window_bounds = array<i64: 1, 128>}, {pipeline_mode = #tpu.pipeline_mode<synchronous>, transform_indices = @transform_5, window_bounds = array<i64: 128, 16>}, {pipeline_mode = #tpu.pipeline_mode<synchronous>, transform_indices = @transform_6, window_bounds = array<i64: 1, 16>}, {transform_indices = @transform_7, window_bounds = array<i64: 128, 16>}]} {
    %c0 = arith.constant 0 : index
    %c0_0 = arith.constant 0 : index
    %0 = vector.load %arg1[%c0, %c0_0] : memref<128x32xf32, #tpu.memory_space<vmem>>, vector<128x32xf32>
    %1 = arith.truncf %0 : vector<128x32xf32> to vector<128x32xbf16>
    %c0_1 = arith.constant 0 : index
    %c0_2 = arith.constant 0 : index
    %2 = vector.load %arg2[%c0_1, %c0_2] : memref<32x128xbf16, #tpu.memory_space<vmem>>, vector<32x128xbf16>
    %cst = arith.constant dense<0.000000e+00> : vector<128x128xf32>
    %3 = tpu.matmul %1, %2, %cst {dimension_numbers = #tpu.dot_dimension_numbers<[1], [0], [0], [1], [0, 0, 1, 1], [], []>} : vector<128x32xbf16>, vector<32x128xbf16>, vector<128x128xf32> -> vector<128x128xf32>
    %c0_3 = arith.constant 0 : index
    %c0_4 = arith.constant 0 : index
    %4 = vector.load %arg3[%c0_3, %c0_4] : memref<1x128xf32, #tpu.memory_space<vmem>>, vector<1x128xf32>
    %5 = vector.broadcast %4 : vector<1x128xf32> to vector<128x128xf32>
    %6 = arith.addf %3, %5 : vector<128x128xf32>
    %cst_5 = arith.constant 0.000000e+00 : f32
    %7 = vector.broadcast %cst_5 : f32 to vector<128x128xf32>
    %8 = arith.maximumf %6, %7 : vector<128x128xf32>
    %9 = arith.truncf %8 : vector<128x128xf32> to vector<128x128xbf16>
    %c0_6 = arith.constant 0 : index
    %c0_7 = arith.constant 0 : index
    %10 = vector.load %arg4[%c0_6, %c0_7] : memref<128x128xbf16, #tpu.memory_space<vmem>>, vector<128x128xbf16>
    %cst_8 = arith.constant dense<0.000000e+00> : vector<128x128xf32>
    %11 = tpu.matmul %9, %10, %cst_8 {dimension_numbers = #tpu.dot_dimension_numbers<[1], [0], [0], [1], [0, 0, 1, 1], [], []>} : vector<128x128xbf16>, vector<128x128xbf16>, vector<128x128xf32> -> vector<128x128xf32>
    %c0_9 = arith.constant 0 : index
    %c0_10 = arith.constant 0 : index
    %12 = vector.load %arg5[%c0_9, %c0_10] : memref<1x128xf32, #tpu.memory_space<vmem>>, vector<1x128xf32>
    %13 = vector.broadcast %12 : vector<1x128xf32> to vector<128x128xf32>
    %14 = arith.addf %11, %13 : vector<128x128xf32>
    %cst_11 = arith.constant 0.000000e+00 : f32
    %15 = vector.broadcast %cst_11 : f32 to vector<128x128xf32>
    %16 = arith.maximumf %14, %15 : vector<128x128xf32>
    %17 = arith.truncf %16 : vector<128x128xf32> to vector<128x128xbf16>
    %c0_12 = arith.constant 0 : index
    %c0_13 = arith.constant 0 : index
    %18 = vector.load %arg6[%c0_12, %c0_13] : memref<128x16xbf16, #tpu.memory_space<vmem>>, vector<128x16xbf16>
    %cst_14 = arith.constant dense<0.000000e+00> : vector<128x16xf32>
    %19 = tpu.matmul %17, %18, %cst_14 {dimension_numbers = #tpu.dot_dimension_numbers<[1], [0], [0], [1], [0, 0, 1, 1], [], []>} : vector<128x128xbf16>, vector<128x16xbf16>, vector<128x16xf32> -> vector<128x16xf32>
    %c0_15 = arith.constant 0 : index
    %c0_16 = arith.constant 0 : index
    %20 = vector.load %arg7[%c0_15, %c0_16] : memref<1x16xf32, #tpu.memory_space<vmem>>, vector<1x16xf32>
    %21 = vector.broadcast %20 : vector<1x16xf32> to vector<128x16xf32>
    %22 = arith.addf %19, %21 : vector<128x16xf32>
    %23 = arith.negf %22 : vector<128x16xf32>
    %24 = math.exp %23 : vector<128x16xf32>
    %cst_17 = arith.constant 1.000000e+00 : f32
    %25 = vector.broadcast %cst_17 : f32 to vector<128x16xf32>
    %26 = arith.addf %25, %24 : vector<128x16xf32>
    %27 = arith.divf %25, %26 : vector<128x16xf32>
    %c0_18 = arith.constant 0 : index
    %c0_19 = arith.constant 0 : index
    %28 = vector.load %arg8[%c0_18, %c0_19] : memref<128x16xf32, #tpu.memory_space<vmem>>, vector<128x16xf32>
    tpu.vector_store %arg8[%c0_18, %c0_19], %27 {strides = array<i32>} : memref<128x16xf32, #tpu.memory_space<vmem>>, vector<128x16xf32>,
    return
  }
  func.func @transform_0(%arg0: i32) -> (i32, i32) {
    %c0_i32 = arith.constant 0 : i32
    %c0_i32_0 = arith.constant 0 : i32
    return %arg0, %c0_i32 : i32, i32
  }
  func.func @transform_1(%arg0: i32) -> (i32, i32) {
    %c0_i32 = arith.constant 0 : i32
    %c0_i32_0 = arith.constant 0 : i32
    %c0_i32_1 = arith.constant 0 : i32
    return %c0_i32, %c0_i32_0 : i32, i32
  }
  func.func @transform_2(%arg0: i32) -> (i32, i32) {
    %c0_i32 = arith.constant 0 : i32
    %c0_i32_0 = arith.constant 0 : i32
    %c0_i32_1 = arith.constant 0 : i32
    return %c0_i32, %c0_i32_0 : i32, i32
  }
  func.func @transform_3(%arg0: i32) -> (i32, i32) {
    %c0_i32 = arith.constant 0 : i32
    %c0_i32_0 = arith.constant 0 : i32
    %c0_i32_1 = arith.constant 0 : i32
    return %c0_i32, %c0_i32_0 : i32, i32
  }
  func.func @transform_4(%arg0: i32) -> (i32, i32) {
    %c0_i32 = arith.constant 0 : i32
    %c0_i32_0 = arith.constant 0 : i32
    %c0_i32_1 = arith.constant 0 : i32
    return %c0_i32, %c0_i32_0 : i32, i32
  }
  func.func @transform_5(%arg0: i32) -> (i32, i32) {
    %c0_i32 = arith.constant 0 : i32
    %c0_i32_0 = arith.constant 0 : i32
    %c0_i32_1 = arith.constant 0 : i32
    return %c0_i32, %c0_i32_0 : i32, i32
  }
  func.func @transform_6(%arg0: i32) -> (i32, i32) {
    %c0_i32 = arith.constant 0 : i32
    %c0_i32_0 = arith.constant 0 : i32
    %c0_i32_1 = arith.constant 0 : i32
    return %c0_i32, %c0_i32_0 : i32, i32
  }
  func.func @transform_7(%arg0: i32) -> (i32, i32) {
    %c0_i32 = arith.constant 0 : i32
    %c0_i32_0 = arith.constant 0 : i32
    return %arg0, %c0_i32 : i32, i32
  }
}

</mosaic_0001>

<bundles_post_ra>
// kernel: tpu_custom_call.1
= control target key start
LH: loop header
LB: loop body
LE: loop exit
PB: predicated region body
PF: predicated region fallthrough
CT: control target
= control target key end

     0   :  { %vm74_vm0 = vcmask 261120   ;;  %vm676_vm1 = vcmask 130048   ;;  %s1191_s1 = inlined_call_operand.vmem [shape: bf16[32,128], index: 1, kind: input, shape index: {}]   ;;  %s1192_s0 = inlined_call_operand.vmem [shape: f32[128,32], index: 0, kind: input, shape index: {}]   ;;  %s1193_s3 = inlined_call_operand.vmem [shape: bf16[128,128], index: 3, kind: input, shape index: {}]   ;;  %s1194_s5 = inlined_call_operand.vmem [shape: bf16[128,16], index: 5, kind: input, shape index: {}]   ;;  %s1195_s2 = inlined_call_operand.vmem [shape: f32[1,128], index: 2, kind: input, shape index: {}]   ;;  %s1196_s4 = inlined_call_operand.vmem [shape: f32[1,128], index: 4, kind: input, shape index: {}]   ;;  %s1197_s6 = inlined_call_operand.vmem [shape: f32[1,16], index: 6, kind: input, shape index: {}]   ;;  %s1198_s7 = inlined_call_operand.vmem [shape: f32[128,16], index: 7, kind: output, shape index: {}]  }
   0x1   :  { %v868_v0 = vld [vmem:[%s1191_s1] sm:$0xff]   ;;  %v869_v1 = vld [vmem:[%s1191_s1 + $0x8] sm:$0xff]   ;;  %v29_v5 = vld [vmem:[%s1192_s0 + $0x10] sm:$0xff] }
   0x2   :  { %784 = vmatprep.subr.bf16.mxu0 %v868_v0  ;;  %v27_v2 = vld [vmem:[%s1192_s0] sm:$0xff]  ;;  %v28_v3 = vld [vmem:[%s1192_s0 + $0x8] sm:$0xff]  ;;  %v30_v6 = vld [vmem:[%s1192_s0 + $0x18] sm:$0xff] }
   0x3   :  { %785 = vmatpush3.bf16.msra.mxu0 %v868_v0  ;;  %v43_v4 = vpack.c.bf16 %v28_v3, %v27_v2  ;;  %v31_v7 = vld [vmem:[%s1192_s0 + $0x20] sm:$0xff]  ;;  %v32_v8 = vld [vmem:[%s1192_s0 + $0x28] sm:$0xff]  ;;  %v44_v9 = vpack.c.bf16 %v30_v6, %v29_v5  ;;  %v33_v12 = vld [vmem:[%s1192_s0 + $0x30] sm:$0xff] }
   0x4   :  { %786 = vmatprep.subr.bf16.mxu0 %v869_v1  ;;  %v45_v10 = vpack.c.bf16 %v32_v8, %v31_v7  ;;  %v870_v11 = vld [vmem:[%s1193_s3] sm:$0xff]   ;;  %v34_v13 = vld [vmem:[%s1192_s0 + $0x38] sm:$0xff]  ;;  %v871_v14 = vld [vmem:[%s1193_s3 + $0x8] sm:$0xff]  }
   0x5   :  { %788 = vmatprep.mubr.msk.bf16.mxu0 %vm74_vm0, %v43_v4  ;;  %v35_v15 = vld [vmem:[%s1192_s0 + $0x40] sm:$0xff]  ;;  %804 = vmatprep.subr.bf16.mxu1 %v870_v11  ;;  %v36_v16 = vld [vmem:[%s1192_s0 + $0x48] sm:$0xff]  ;;  %v872_v17 = vld [vmem:[%s1193_s3 + $0x10] sm:$0xff]   ;;  %v46_v18 = vpack.c.bf16 %v34_v13, %v33_v12 }
   0x6   :  { %805 = vmatpush3.bf16.msra.mxu1 %v870_v11  ;;  %v47_v19 = vpack.c.bf16 %v36_v16, %v35_v15  ;;  %v873_v20 = vld [vmem:[%s1193_s3 + $0x18] sm:$0xff]   ;;  %v37_v21 = vld [vmem:[%s1192_s0 + $0x50] sm:$0xff]  ;;  %v39_v23 = vld [vmem:[%s1192_s0 + $0x60] sm:$0xff] }
   0x7   :  { %787 = vmatpush3.bf16.msra.mxu0 %v869_v1  ;;  %806 = vmatprep.subr.bf16.mxu1 %v871_v14  ;;  %v38_v22 = vld [vmem:[%s1192_s0 + $0x58] sm:$0xff]  ;;  %v40_v24 = vld [vmem:[%s1192_s0 + $0x68] sm:$0xff]  ;;  %v874_v25 = vld [vmem:[%s1193_s3 + $0x20] sm:$0xff]  }
   0x8   :  { %v48_v26 = vpack.c.bf16 %v38_v22, %v37_v21  ;;  %v49_v27 = vpack.c.bf16 %v40_v24, %v39_v23  ;;  %v875_v28 = vld [vmem:[%s1193_s3 + $0x28] sm:$0xff]   ;;  %v41_v29 = vld [vmem:[%s1192_s0 + $0x70] sm:$0xff]  ;;  %v42_v30 = vld [vmem:[%s1192_s0 + $0x78] sm:$0xff] }
   0x9   :  { %v50_v31 = vpack.c.bf16 %v42_v30, %v41_v29  ;;  %v876_v32 = vld [vmem:[%s1193_s3 + $0x30] sm:$0xff]   ;;  %v877_v33 = vld [vmem:[%s1193_s3 + $0x38] sm:$0xff]   ;;  %v878_v34 = vld [vmem:[%s1194_s5] sm:$0xff]  }
   0xa   :  { %789 = vmatmul.mubr.msk.bf16.vlgmr.msra.gmra.mrb[0].mxu0 %vm74_vm0, %v44_v9  ;;  %807 = vmatpush3.bf16.msra.mxu1 %v871_v14  ;;  %v879_v35 = vld [vmem:[%s1194_s5 + $0x8] sm:$0xff]   ;;  %v880_v36 = vld [vmem:[%s1194_s5 + $0x10] sm:$0xff]   ;;  %v881_v37 = vld [vmem:[%s1194_s5 + $0x18] sm:$0xff]  }
   0xb   :  { %792 = vmatprep.mubr.msk.bf16.mxu0 %vm74_vm0, %v45_v10  ;;  %808 = vmatprep.subr.bf16.mxu1 %v872_v17  ;;  %v882_v38 = vld [vmem:[%s1194_s5 + $0x20] sm:$0xff]   ;;  %v883_v39 = vld [vmem:[%s1194_s5 + $0x28] sm:$0xff]  }
   0xc   :  { %836 = vmatprep.subr.bf16.mxu0 %v878_v34  ;;  %v697_v40 = vld [vmem:[%s1195_s2] ss:$0 sm:$0xff] }
   0xd   :  { %837 = vmatpush3.bf16.msra.mxu0 %v878_v34  ;;  %v885_v34 = vld [vmem:[%s1194_s5 + $0x38] sm:$0xff]  }
   0xe   :  { %809 = vmatpush3.bf16.msra.mxu1 %v872_v17  ;;  %838 = vmatprep.subr.bf16.mxu0 %v879_v35 }
   0xf   :  { %810 = vmatprep.subr.bf16.mxu1 %v873_v20 }
  0x11   :  { %839 = vmatpush3.bf16.msra.mxu0 %v879_v35  ;;  %v708_v35 = vld [vmem:[%s1196_s4] ss:$0 sm:$0xff] }
  0x12   :  { %793 = vmatmul.mubr.msk.bf16.gmra.mrb[4].mxu0 %vm74_vm0, %v46_v18  ;;  %811 = vmatpush3.bf16.msra.mxu1 %v873_v20 }
  0x13   :  { %796 = vmatprep.mubr.msk.bf16.mxu0 %vm74_vm0, %v47_v19  ;;  %812 = vmatprep.subr.bf16.mxu1 %v874_v25 }
  0x14   :  { %840 = vmatprep.subr.bf16.mxu0 %v880_v36 }
  0x15   :  { %841 = vmatpush3.bf16.msra.mxu0 %v880_v36 }
  0x16   :  { %813 = vmatpush3.bf16.msra.mxu1 %v874_v25  ;;  %842 = vmatprep.subr.bf16.mxu0 %v881_v37 }
  0x17   :  { %814 = vmatprep.subr.bf16.mxu1 %v875_v28 }
  0x19   :  { %843 = vmatpush3.bf16.msra.mxu0 %v881_v37 }
  0x1a   :  { %797 = vmatmul.mubr.msk.bf16.gmra.mrb[8].mxu0 %vm74_vm0, %v48_v26  ;;  %815 = vmatpush3.bf16.msra.mxu1 %v875_v28 }
  0x1b   :  { %800 = vmatprep.mubr.msk.bf16.mxu0 %vm74_vm0, %v49_v27  ;;  %816 = vmatprep.subr.bf16.mxu1 %v876_v32 }
  0x1c   :  { %844 = vmatprep.subr.bf16.mxu0 %v882_v38 }
  0x1d   :  { %845 = vmatpush3.bf16.msra.mxu0 %v882_v38 }
  0x1e   :  { %817 = vmatpush3.bf16.msra.mxu1 %v876_v32  ;;  %846 = vmatprep.subr.bf16.mxu0 %v883_v39 }
  0x1f   :  { %818 = vmatprep.subr.bf16.mxu1 %v877_v33 }
  0x21   :  { %847 = vmatpush3.bf16.msra.mxu0 %v883_v39 }
  0x22   :  { %801 = vmatmul.mubr.msk.bf16.gmra.mrb[12].mxu0 %vm74_vm0, %v50_v31  ;;  %819 = vmatpush3.bf16.msra.mxu1 %v877_v33  ;;  %v884_v33 = vld [vmem:[%s1194_s5 + $0x30] sm:$0xff]  }
  0x23   :  { %848 = vmatprep.subr.bf16.mxu0 %v884_v33 }
  0x25   :  { %849 = vmatpush3.bf16.msra.mxu0 %v884_v33 }
  0x26   :  { %850 = vmatprep.subr.bf16.mxu0 %v885_v34 }
  0x29   :  { %851 = vmatpush3.bf16.msra.mxu0 %v885_v34 }
  0xdd   :  { %v790_v41 = vpop.f32.mrb[0].mxu0 }
  0xde   :  { %v142_v42 = vadd.f32 %v790_v41, %v697_v40  ;;  %v133_v43 = vpop.f32.mrb[1].mxu0 }
  0xdf   :  { %v134_v44 = vadd.f32 %v697_v40, %v133_v43  ;;  %v791_v45 = vpop.f32.mrb[2].mxu0 }
  0xe0   :  { %v145_v46 = vadd.f32 %v791_v45, %v697_v40  ;;  %v136_v47 = vpop.f32.mrb[3].mxu0  ;;  %v198_v49 = vmax.f32 %v142_v42, 0.0 }
  0xe1   :  { %v137_v48 = vadd.f32 %v697_v40, %v136_v47  ;;  %v196_v51 = vmax.f32 %v134_v44, 0.0 }
  0xe2   :  { %v199_v50 = vmax.f32 %v145_v46, 0.0 }
  0xe3   :  { %v197_v52 = vmax.f32 %v137_v48, 0.0 }
  0xe4   :  { %v213_v53 = vpack.c.bf16 %v199_v50, %v198_v49 }
  0xe5   :  { %v794_v54 = vpop.f32.mrb[4].mxu0  ;;  %v212_v55 = vpack.c.bf16 %v197_v52, %v196_v51 }
  0xe6   :  { %v158_v56 = vadd.f32 %v794_v54, %v697_v40  ;;  %v149_v57 = vpop.f32.mrb[5].mxu0 }
  0xe7   :  { %v150_v58 = vadd.f32 %v697_v40, %v149_v57  ;;  %v795_v59 = vpop.f32.mrb[6].mxu0  ;;  %820 = vmatprep.mubr.bf16.mxu1 %v212_v55 }
  0xe8   :  { %v161_v60 = vadd.f32 %v795_v59, %v697_v40  ;;  %v152_v61 = vpop.f32.mrb[7].mxu0  ;;  %821 = vmatmul.mubr.bf16.vlgmr.msra.gmra.mrb[0].mxu1 %v213_v53  ;;  %v202_v63 = vmax.f32 %v158_v56, 0.0 }
  0xe9   :  { %v153_v62 = vadd.f32 %v697_v40, %v152_v61  ;;  %v200_v1 = vmax.f32 %v150_v58, 0.0 }
  0xea   :  { %v203_v0 = vmax.f32 %v161_v60, 0.0 }
  0xeb   :  { %v201_v2 = vmax.f32 %v153_v62, 0.0 }
  0xec   :  { %v215_v3 = vpack.c.bf16 %v203_v0, %v202_v63 }
  0xed   :  { %v214_v4 = vpack.c.bf16 %v201_v2, %v200_v1  ;;  %v798_v5 = vpop.f32.mrb[8].mxu0 }
  0xee   :  { %v174_v6 = vadd.f32 %v798_v5, %v697_v40  ;;  %v165_v7 = vpop.f32.mrb[9].mxu0 }
  0xef   :  { %v166_v8 = vadd.f32 %v697_v40, %v165_v7  ;;  %v799_v9 = vpop.f32.mrb[10].mxu0  ;;  %824 = vmatprep.mubr.bf16.mxu1 %v214_v4 }
  0xf0   :  { %v177_v10 = vadd.f32 %v799_v9, %v697_v40  ;;  %v168_v11 = vpop.f32.mrb[11].mxu0  ;;  %825 = vmatmul.mubr.bf16.gmra.mrb[4].mxu1 %v215_v3  ;;  %v206_v13 = vmax.f32 %v174_v6, 0.0 }
  0xf1   :  { %v169_v12 = vadd.f32 %v697_v40, %v168_v11  ;;  %v204_v15 = vmax.f32 %v166_v8, 0.0 }
  0xf2   :  { %v207_v14 = vmax.f32 %v177_v10, 0.0 }
  0xf3   :  { %v205_v16 = vmax.f32 %v169_v12, 0.0 }
  0xf4   :  { %v217_v17 = vpack.c.bf16 %v207_v14, %v206_v13 }
  0xf5   :  { %v216_v18 = vpack.c.bf16 %v205_v16, %v204_v15  ;;  %v802_v19 = vpop.f32.mrb[12].mxu0 }
  0xf6   :  { %v190_v20 = vadd.f32 %v802_v19, %v697_v40  ;;  %v181_v21 = vpop.f32.mrb[13].mxu0 }
  0xf7   :  { %v182_v22 = vadd.f32 %v697_v40, %v181_v21  ;;  %v803_v23 = vpop.f32.mrb[14].mxu0  ;;  %828 = vmatprep.mubr.bf16.mxu1 %v216_v18 }
  0xf8   :  { %v193_v24 = vadd.f32 %v803_v23, %v697_v40  ;;  %v184_v25 = vpop.f32.mrb[15].mxu0  ;;  %829 = vmatmul.mubr.bf16.gmra.mrb[8].mxu1 %v217_v17  ;;  %v210_v27 = vmax.f32 %v190_v20, 0.0 }
  0xf9   :  { %v185_v26 = vadd.f32 %v697_v40, %v184_v25  ;;  %v208_v29 = vmax.f32 %v182_v22, 0.0 }
  0xfa   :  { %v211_v28 = vmax.f32 %v193_v24, 0.0 }
  0xfb   :  { %v209_v30 = vmax.f32 %v185_v26, 0.0 }
  0xfc   :  { %v219_v31 = vpack.c.bf16 %v211_v28, %v210_v27  ;;  %v1109_v28 = vld [vmem:[%s1197_s6] ss:$0 sm:$0xff] }
  0xfd   :  { %v218_v32 = vpack.c.bf16 %v209_v30, %v208_v29 }
  0xff   :  { %832 = vmatprep.mubr.bf16.mxu1 %v218_v32 }
 0x100   :  { %833 = vmatmul.mubr.bf16.gmra.mrb[12].mxu1 %v219_v31 }
 0x1bb   :  { %v822_v36 = vpop.f32.mrb[0].mxu1 }
 0x1bc   :  { %v334_v37 = vadd.f32 %v822_v36, %v708_v35  ;;  %v325_v38 = vpop.f32.mrb[1].mxu1 }
 0x1bd   :  { %v326_v39 = vadd.f32 %v708_v35, %v325_v38  ;;  %v823_v40 = vpop.f32.mrb[2].mxu1 }
 0x1be   :  { %v337_v41 = vadd.f32 %v823_v40, %v708_v35  ;;  %v328_v42 = vpop.f32.mrb[3].mxu1  ;;  %v390_v44 = vmax.f32 %v334_v37, 0.0 }
 0x1bf   :  { %v329_v43 = vadd.f32 %v708_v35, %v328_v42  ;;  %v388_v46 = vmax.f32 %v326_v39, 0.0 }
 0x1c0   :  { %v391_v45 = vmax.f32 %v337_v41, 0.0 }
 0x1c1   :  { %v389_v47 = vmax.f32 %v329_v43, 0.0 }
 0x1c2   :  { %v405_v48 = vpack.c.bf16 %v391_v45, %v390_v44 }
 0x1c3   :  { %v404_v49 = vpack.c.bf16 %v389_v47, %v388_v46  ;;  %v826_v50 = vpop.f32.mrb[4].mxu1 }
 0x1c4   :  { %v350_v51 = vadd.f32 %v826_v50, %v708_v35  ;;  %v341_v52 = vpop.f32.mrb[5].mxu1 }
 0x1c5   :  { %v342_v53 = vadd.f32 %v708_v35, %v341_v52  ;;  %v827_v54 = vpop.f32.mrb[6].mxu1  ;;  %852 = vmatprep.mubr.bf16.mxu0 %v404_v49 }
 0x1c6   :  { %v353_v55 = vadd.f32 %v827_v54, %v708_v35  ;;  %v344_v56 = vpop.f32.mrb[7].mxu1  ;;  %853 = vmatmul.mubr.bf16.vlgmr.msra.gmra.mrb[16].mxu0 %v405_v48  ;;  %v394_v58 = vmax.f32 %v350_v51, 0.0 }
 0x1c7   :  { %v345_v57 = vadd.f32 %v708_v35, %v344_v56  ;;  %v392_v60 = vmax.f32 %v342_v53, 0.0 }
 0x1c8   :  { %v395_v59 = vmax.f32 %v353_v55, 0.0 }
 0x1c9   :  { %v393_v61 = vmax.f32 %v345_v57, 0.0 }
 0x1ca   :  { %v407_v62 = vpack.c.bf16 %v395_v59, %v394_v58 }
 0x1cb   :  { %v406_v63 = vpack.c.bf16 %v393_v61, %v392_v60  ;;  %v830_v0 = vpop.f32.mrb[8].mxu1 }
 0x1cc   :  { %v366_v1 = vadd.f32 %v830_v0, %v708_v35  ;;  %v357_v2 = vpop.f32.mrb[9].mxu1 }
 0x1cd   :  { %v358_v3 = vadd.f32 %v708_v35, %v357_v2  ;;  %v831_v4 = vpop.f32.mrb[10].mxu1  ;;  %856 = vmatprep.mubr.bf16.mxu0 %v406_v63 }
 0x1ce   :  { %v369_v5 = vadd.f32 %v831_v4, %v708_v35  ;;  %v360_v6 = vpop.f32.mrb[11].mxu1  ;;  %857 = vmatmul.mubr.bf16.gmra.mrb[20].mxu0 %v407_v62  ;;  %v398_v8 = vmax.f32 %v366_v1, 0.0 }
 0x1cf   :  { %v361_v7 = vadd.f32 %v708_v35, %v360_v6  ;;  %v396_v10 = vmax.f32 %v358_v3, 0.0 }
 0x1d0   :  { %v399_v9 = vmax.f32 %v369_v5, 0.0 }
 0x1d1   :  { %v397_v11 = vmax.f32 %v361_v7, 0.0 }
 0x1d2   :  { %v409_v12 = vpack.c.bf16 %v399_v9, %v398_v8 }
 0x1d3   :  { %v408_v13 = vpack.c.bf16 %v397_v11, %v396_v10  ;;  %v834_v14 = vpop.f32.mrb[12].mxu1 }
 0x1d4   :  { %v382_v15 = vadd.f32 %v834_v14, %v708_v35  ;;  %v373_v16 = vpop.f32.mrb[13].mxu1 }
 0x1d5   :  { %v374_v17 = vadd.f32 %v708_v35, %v373_v16  ;;  %v835_v18 = vpop.f32.mrb[14].mxu1  ;;  %860 = vmatprep.mubr.bf16.mxu0 %v408_v13 }
 0x1d6   :  { %v385_v19 = vadd.f32 %v835_v18, %v708_v35  ;;  %v376_v20 = vpop.f32.mrb[15].mxu1  ;;  %861 = vmatmul.mubr.bf16.gmra.mrb[24].mxu0 %v409_v12  ;;  %v402_v22 = vmax.f32 %v382_v15, 0.0 }
 0x1d7   :  { %v377_v21 = vadd.f32 %v708_v35, %v376_v20  ;;  %v400_v24 = vmax.f32 %v374_v17, 0.0 }
 0x1d8   :  { %v403_v23 = vmax.f32 %v385_v19, 0.0 }
 0x1d9   :  { %v401_v25 = vmax.f32 %v377_v21, 0.0 }
 0x1da   :  { %v411_v26 = vpack.c.bf16 %v403_v23, %v402_v22 }
 0x1db   :  { %v410_v27 = vpack.c.bf16 %v401_v25, %v400_v24 }
 0x1dd   :  { %864 = vmatprep.mubr.bf16.mxu0 %v410_v27 }
 0x1de   :  { %865 = vmatmul.mubr.bf16.gmra.mrb[28].mxu0 %v411_v26 }
 0x299   :  { %v854_v29 = vpop.f32.mrb[16].mxu0 }
 0x29a   :  { %v526_v30 = vadd.f32 %v854_v29, %v1109_v28  ;;  %v517_v31 = vpop.f32.mrb[17].mxu0 }
 0x29b   :  { %v518_v32 = vadd.f32 %v1109_v28, %v517_v31  ;;  %v855_v33 = vpop.f32.mrb[18].mxu0 }
 0x29c   :  { %v728_v34 = vmul.f32 -1.442695, %v526_v30  ;;  %v529_v35 = vadd.f32 %v855_v33, %v1109_v28  ;;  %v520_v36 = vpop.f32.mrb[19].mxu0 }
 0x29d   :  { %v726_v37 = vmul.f32 -1.442695, %v518_v32  ;;  %v521_v38 = vadd.f32 %v1109_v28, %v520_v36 }
 0x29e   :  { %886 = vpow2.f32 %v728_v34  ;;  %v729_v39 = vmul.f32 -1.442695, %v529_v35 }
 0x29f   :  { %888 = vpow2.f32 %v726_v37  ;;  %v727_v40 = vmul.f32 -1.442695, %v521_v38 }
 0x2a0   :  { %890 = vpow2.f32 %v729_v39 }
 0x2a1   :  { %892 = vpow2.f32 %v727_v40  ;;  %v858_v41 = vpop.f32.mrb[20].mxu0 }
 0x2a2   :  { %v542_v42 = vadd.f32 %v858_v41, %v1109_v28  ;;  %v533_v43 = vpop.f32.mrb[21].mxu0 }
 0x2a3   :  { %v534_v44 = vadd.f32 %v1109_v28, %v533_v43  ;;  %v859_v45 = vpop.f32.mrb[22].mxu0 }
 0x2a4   :  { %v732_v46 = vmul.f32 -1.442695, %v542_v42  ;;  %v545_v47 = vadd.f32 %v859_v45, %v1109_v28  ;;  %v536_v48 = vpop.f32.mrb[23].mxu0 }
 0x2a5   :  { %v730_v49 = vmul.f32 -1.442695, %v534_v44  ;;  %v537_v50 = vadd.f32 %v1109_v28, %v536_v48 }
 0x2a6   :  { %894 = vpow2.f32 %v732_v46  ;;  %v733_v51 = vmul.f32 -1.442695, %v545_v47 }
 0x2a7   :  { %896 = vpow2.f32 %v730_v49  ;;  %v731_v52 = vmul.f32 -1.442695, %v537_v50 }
 0x2a8   :  { %v887_v53 = vpop.eup %886  ;;  %898 = vpow2.f32 %v733_v51 }
 0x2a9   :  { %v889_v54 = vpop.eup %888  ;;  %v630_v55 = vadd.f32 1.0, %v887_v53  ;;  %900 = vpow2.f32 %v731_v52  ;;  %v862_v56 = vpop.f32.mrb[24].mxu0 }
 0x2aa   :  { %v891_v57 = vpop.eup %890  ;;  %v628_v58 = vadd.f32 1.0, %v889_v54  ;;  %v558_v59 = vadd.f32 %v862_v56, %v1109_v28  ;;  %v549_v60 = vpop.f32.mrb[25].mxu0 }
 0x2ab   :  { %v893_v61 = vpop.eup %892  ;;  %902 = vrcp.f32 %v630_v55  ;;  %v631_v62 = vadd.f32 1.0, %v891_v57  ;;  %v550_v63 = vadd.f32 %v1109_v28, %v549_v60  ;;  %v863_v0 = vpop.f32.mrb[26].mxu0 }
 0x2ac   :  { %904 = vrcp.f32 %v628_v58  ;;  %v629_v1 = vadd.f32 1.0, %v893_v61  ;;  %v736_v2 = vmul.f32 -1.442695, %v558_v59  ;;  %v561_v3 = vadd.f32 %v863_v0, %v1109_v28  ;;  %v552_v4 = vpop.f32.mrb[27].mxu0 }
 0x2ad   :  { %906 = vrcp.f32 %v631_v62  ;;  %v734_v5 = vmul.f32 -1.442695, %v550_v63  ;;  %v553_v6 = vadd.f32 %v1109_v28, %v552_v4 }
 0x2ae   :  { %908 = vrcp.f32 %v629_v1  ;;  %v737_v7 = vmul.f32 -1.442695, %v561_v3 }
 0x2af   :  { %910 = vpow2.f32 %v736_v2  ;;  %v735_v8 = vmul.f32 -1.442695, %v553_v6 }
 0x2b0   :  { %v895_v9 = vpop.eup %894  ;;  %912 = vpow2.f32 %v734_v5 }
 0x2b1   :  { %v897_v10 = vpop.eup %896  ;;  %v634_v11 = vadd.f32 1.0, %v895_v9  ;;  %914 = vpow2.f32 %v737_v7  ;;  %v866_v12 = vpop.f32.mrb[28].mxu0 }
 0x2b2   :  { %v899_v13 = vpop.eup %898  ;;  %v632_v14 = vadd.f32 1.0, %v897_v10  ;;  %916 = vpow2.f32 %v735_v8  ;;  %v574_v15 = vadd.f32 %v866_v12, %v1109_v28  ;;  %v565_v16 = vpop.f32.mrb[29].mxu0 }
 0x2b3   :  { %v901_v17 = vpop.eup %900  ;;  %918 = vrcp.f32 %v634_v11  ;;  %v635_v18 = vadd.f32 1.0, %v899_v13  ;;  %v566_v19 = vadd.f32 %v1109_v28, %v565_v16  ;;  %v867_v20 = vpop.f32.mrb[30].mxu0 }
 0x2b4   :  { %920 = vrcp.f32 %v632_v14  ;;  %v633_v21 = vadd.f32 1.0, %v901_v17  ;;  %v740_v22 = vmul.f32 -1.442695, %v574_v15  ;;  %v577_v23 = vadd.f32 %v867_v20, %v1109_v28  ;;  %v568_v24 = vpop.f32.mrb[31].mxu0 }
 0x2b5   :  { %v903_v25 = vpop.eup %902  ;;  %922 = vrcp.f32 %v635_v18  ;;  %v738_v26 = vmul.f32 -1.442695, %v566_v19  ;;  %v569_v27 = vadd.f32 %v1109_v28, %v568_v24 }
 0x2b6   :  { %v905_v29 = vpop.eup %904  ;;  %679 = vst.msk [vmem:[%s1198_s7 + $0x10] sm:$0xff] %vm676_vm1, %v903_v25  ;;  %924 = vrcp.f32 %v633_v21  ;;  %v741_v30 = vmul.f32 -1.442695, %v577_v23 }
 0x2b7   :  { %v907_v31 = vpop.eup %906  ;;  %677 = vst.msk [vmem:[%s1198_s7] sm:$0xff] %vm676_vm1, %v905_v29  ;;  %926 = vpow2.f32 %v740_v22  ;;  %v739_v32 = vmul.f32 -1.442695, %v569_v27 }
 0x2b8   :  { %v909_v33 = vpop.eup %908  ;;  %680 = vst.msk [vmem:[%s1198_s7 + $0x18] sm:$0xff] %vm676_vm1, %v907_v31  ;;  %928 = vpow2.f32 %v738_v26 }
 0x2b9   :  { %v911_v28 = vpop.eup %910  ;;  %678 = vst.msk [vmem:[%s1198_s7 + $0x8] sm:$0xff] %vm676_vm1, %v909_v33  ;;  %930 = vpow2.f32 %v741_v30 }
 0x2ba   :  { %v913_v34 = vpop.eup %912  ;;  %v638_v35 = vadd.f32 1.0, %v911_v28  ;;  %932 = vpow2.f32 %v739_v32 }
 0x2bb   :  { %v915_v36 = vpop.eup %914  ;;  %v636_v37 = vadd.f32 1.0, %v913_v34 }
 0x2bc   :  { %v917_v38 = vpop.eup %916  ;;  %934 = vrcp.f32 %v638_v35  ;;  %v639_v39 = vadd.f32 1.0, %v915_v36 }
 0x2bd   :  { %v919_v40 = vpop.eup %918  ;;  %936 = vrcp.f32 %v636_v37  ;;  %v637_v41 = vadd.f32 1.0, %v917_v38 }
 0x2be   :  { %v921_v42 = vpop.eup %920  ;;  %683 = vst.msk [vmem:[%s1198_s7 + $0x30] sm:$0xff] %vm676_vm1, %v919_v40  ;;  %938 = vrcp.f32 %v639_v39 }
 0x2bf   :  { %v923_v43 = vpop.eup %922  ;;  %681 = vst.msk [vmem:[%s1198_s7 + $0x20] sm:$0xff] %vm676_vm1, %v921_v42  ;;  %940 = vrcp.f32 %v637_v41 }
 0x2c0   :  { %v925_v44 = vpop.eup %924  ;;  %684 = vst.msk [vmem:[%s1198_s7 + $0x38] sm:$0xff] %vm676_vm1, %v923_v43 }
 0x2c1   :  { %v927_v45 = vpop.eup %926  ;;  %682 = vst.msk [vmem:[%s1198_s7 + $0x28] sm:$0xff] %vm676_vm1, %v925_v44 }
 0x2c2   :  { %v929_v46 = vpop.eup %928  ;;  %v642_v47 = vadd.f32 1.0, %v927_v45 }
 0x2c3   :  { %v931_v48 = vpop.eup %930  ;;  %v640_v49 = vadd.f32 1.0, %v929_v46 }
 0x2c4   :  { %v933_v50 = vpop.eup %932  ;;  %942 = vrcp.f32 %v642_v47  ;;  %v643_v51 = vadd.f32 1.0, %v931_v48 }
 0x2c5   :  { %944 = vrcp.f32 %v640_v49  ;;  %v641_v52 = vadd.f32 1.0, %v933_v50 }
 0x2c6   :  { %v935_v53 = vpop.eup %934  ;;  %946 = vrcp.f32 %v643_v51 }
 0x2c7   :  { %v937_v54 = vpop.eup %936  ;;  %687 = vst.msk [vmem:[%s1198_s7 + $0x50] sm:$0xff] %vm676_vm1, %v935_v53  ;;  %948 = vrcp.f32 %v641_v52 }
 0x2c8   :  { %v939_v55 = vpop.eup %938  ;;  %685 = vst.msk [vmem:[%s1198_s7 + $0x40] sm:$0xff] %vm676_vm1, %v937_v54 }
 0x2c9   :  { %v941_v56 = vpop.eup %940  ;;  %688 = vst.msk [vmem:[%s1198_s7 + $0x58] sm:$0xff] %vm676_vm1, %v939_v55 }
 0x2ca   :  { %686 = vst.msk [vmem:[%s1198_s7 + $0x48] sm:$0xff] %vm676_vm1, %v941_v56 }
 0x2ce   :  { %v943_v57 = vpop.eup %942 }
 0x2cf   :  { %v945_v58 = vpop.eup %944  ;;  %691 = vst.msk [vmem:[%s1198_s7 + $0x70] sm:$0xff] %vm676_vm1, %v943_v57 }
 0x2d0   :  { %v947_v59 = vpop.eup %946  ;;  %689 = vst.msk [vmem:[%s1198_s7 + $0x60] sm:$0xff] %vm676_vm1, %v945_v58 }
 0x2d1   :  { %v949_v60 = vpop.eup %948  ;;  %692 = vst.msk [vmem:[%s1198_s7 + $0x78] sm:$0xff] %vm676_vm1, %v947_v59 }
 0x2d2   :  { %690 = vst.msk [vmem:[%s1198_s7 + $0x68] sm:$0xff] %vm676_vm1, %v949_v60 }

// kernel: tpu_custom_call.1
= control target key start
LH: loop header
LB: loop body
LE: loop exit
PB: predicated region body
PF: predicated region fallthrough
CT: control target
= control target key end

     0   :  { %vm74_vm0 = vcmask 261120   ;;  %vm676_vm1 = vcmask 130048   ;;  %s1191_s1 = inlined_call_operand.vmem [shape: bf16[32,128], index: 1, kind: input, shape index: {}]   ;;  %s1192_s0 = inlined_call_operand.vmem [shape: f32[128,32], index: 0, kind: input, shape index: {}]   ;;  %s1193_s3 = inlined_call_operand.vmem [shape: bf16[128,128], index: 3, kind: input, shape index: {}]   ;;  %s1194_s5 = inlined_call_operand.vmem [shape: bf16[128,16], index: 5, kind: input, shape index: {}]   ;;  %s1195_s2 = inlined_call_operand.vmem [shape: f32[1,128], index: 2, kind: input, shape index: {}]   ;;  %s1196_s4 = inlined_call_operand.vmem [shape: f32[1,128], index: 4, kind: input, shape index: {}]   ;;  %s1197_s6 = inlined_call_operand.vmem [shape: f32[1,16], index: 6, kind: input, shape index: {}]   ;;  %s1198_s7 = inlined_call_operand.vmem [shape: f32[128,16], index: 7, kind: output, shape index: {}]  }
   0x1   :  { %v868_v0 = vld [vmem:[%s1191_s1] sm:$0xff]   ;;  %v869_v1 = vld [vmem:[%s1191_s1 + $0x8] sm:$0xff]   ;;  %v29_v5 = vld [vmem:[%s1192_s0 + $0x10] sm:$0xff] }
   0x2   :  { %784 = vmatprep.subr.bf16.mxu0 %v868_v0  ;;  %v27_v2 = vld [vmem:[%s1192_s0] sm:$0xff]  ;;  %v28_v3 = vld [vmem:[%s1192_s0 + $0x8] sm:$0xff]  ;;  %v30_v6 = vld [vmem:[%s1192_s0 + $0x18] sm:$0xff] }
   0x3   :  { %785 = vmatpush3.bf16.msra.mxu0 %v868_v0  ;;  %v43_v4 = vpack.c.bf16 %v28_v3, %v27_v2  ;;  %v31_v7 = vld [vmem:[%s1192_s0 + $0x20] sm:$0xff]  ;;  %v32_v8 = vld [vmem:[%s1192_s0 + $0x28] sm:$0xff]  ;;  %v44_v9 = vpack.c.bf16 %v30_v6, %v29_v5  ;;  %v33_v12 = vld [vmem:[%s1192_s0 + $0x30] sm:$0xff] }
   0x4   :  { %786 = vmatprep.subr.bf16.mxu0 %v869_v1  ;;  %v45_v10 = vpack.c.bf16 %v32_v8, %v31_v7  ;;  %v870_v11 = vld [vmem:[%s1193_s3] sm:$0xff]   ;;  %v34_v13 = vld [vmem:[%s1192_s0 + $0x38] sm:$0xff]  ;;  %v871_v14 = vld [vmem:[%s1193_s3 + $0x8] sm:$0xff]  }
   0x5   :  { %788 = vmatprep.mubr.msk.bf16.mxu0 %vm74_vm0, %v43_v4  ;;  %v35_v15 = vld [vmem:[%s1192_s0 + $0x40] sm:$0xff]  ;;  %804 = vmatprep.subr.bf16.mxu1 %v870_v11  ;;  %v36_v16 = vld [vmem:[%s1192_s0 + $0x48] sm:$0xff]  ;;  %v872_v17 = vld [vmem:[%s1193_s3 + $0x10] sm:$0xff]   ;;  %v46_v18 = vpack.c.bf16 %v34_v13, %v33_v12 }
   0x6   :  { %805 = vmatpush3.bf16.msra.mxu1 %v870_v11  ;;  %v47_v19 = vpack.c.bf16 %v36_v16, %v35_v15  ;;  %v873_v20 = vld [vmem:[%s1193_s3 + $0x18] sm:$0xff]   ;;  %v37_v21 = vld [vmem:[%s1192_s0 + $0x50] sm:$0xff]  ;;  %v39_v23 = vld [vmem:[%s1192_s0 + $0x60] sm:$0xff] }
   0x7   :  { %787 = vmatpush3.bf16.msra.mxu0 %v869_v1  ;;  %806 = vmatprep.subr.bf16.mxu1 %v871_v14  ;;  %v38_v22 = vld [vmem:[%s1192_s0 + $0x58] sm:$0xff]  ;;  %v40_v24 = vld [vmem:[%s1192_s0 + $0x68] sm:$0xff]  ;;  %v874_v25 = vld [vmem:[%s1193_s3 + $0x20] sm:$0xff]  }
   0x8   :  { %v48_v26 = vpack.c.bf16 %v38_v22, %v37_v21  ;;  %v49_v27 = vpack.c.bf16 %v40_v24, %v39_v23  ;;  %v875_v28 = vld [vmem:[%s1193_s3 + $0x28] sm:$0xff]   ;;  %v41_v29 = vld [vmem:[%s1192_s0 + $0x70] sm:$0xff]  ;;  %v42_v30 = vld [vmem:[%s1192_s0 + $0x78] sm:$0xff] }
   0x9   :  { %v50_v31 = vpack.c.bf16 %v42_v30, %v41_v29  ;;  %v876_v32 = vld [vmem:[%s1193_s3 + $0x30] sm:$0xff]   ;;  %v877_v33 = vld [vmem:[%s1193_s3 + $0x38] sm:$0xff]   ;;  %v878_v34 = vld [vmem:[%s1194_s5] sm:$0xff]  }
   0xa   :  { %789 = vmatmul.mubr.msk.bf16.vlgmr.msra.gmra.mrb[0].mxu0 %vm74_vm0, %v44_v9  ;;  %807 = vmatpush3.bf16.msra.mxu1 %v871_v14  ;;  %v879_v35 = vld [vmem:[%s1194_s5 + $0x8] sm:$0xff]   ;;  %v880_v36 = vld [vmem:[%s1194_s5 + $0x10] sm:$0xff]   ;;  %v881_v37 = vld [vmem:[%s1194_s5 + $0x18] sm:$0xff]  }
   0xb   :  { %792 = vmatprep.mubr.msk.bf16.mxu0 %vm74_vm0, %v45_v10  ;;  %808 = vmatprep.subr.bf16.mxu1 %v872_v17  ;;  %v882_v38 = vld [vmem:[%s1194_s5 + $0x20] sm:$0xff]   ;;  %v883_v39 = vld [vmem:[%s1194_s5 + $0x28] sm:$0xff]  }
   0xc   :  { %836 = vmatprep.subr.bf16.mxu0 %v878_v34  ;;  %v697_v40 = vld [vmem:[%s1195_s2] ss:$0 sm:$0xff] }
   0xd   :  { %837 = vmatpush3.bf16.msra.mxu0 %v878_v34  ;;  %v885_v34 = vld [vmem:[%s1194_s5 + $0x38] sm:$0xff]  }
   0xe   :  { %809 = vmatpush3.bf16.msra.mxu1 %v872_v17  ;;  %838 = vmatprep.subr.bf16.mxu0 %v879_v35 }
   0xf   :  { %810 = vmatprep.subr.bf16.mxu1 %v873_v20 }
  0x11   :  { %839 = vmatpush3.bf16.msra.mxu0 %v879_v35  ;;  %v708_v35 = vld [vmem:[%s1196_s4] ss:$0 sm:$0xff] }
  0x12   :  { %793 = vmatmul.mubr.msk.bf16.gmra.mrb[4].mxu0 %vm74_vm0, %v46_v18  ;;  %811 = vmatpush3.bf16.msra.mxu1 %v873_v20 }
  0x13   :  { %796 = vmatprep.mubr.msk.bf16.mxu0 %vm74_vm0, %v47_v19  ;;  %812 = vmatprep.subr.bf16.mxu1 %v874_v25 }
  0x14   :  { %840 = vmatprep.subr.bf16.mxu0 %v880_v36 }
  0x15   :  { %841 = vmatpush3.bf16.msra.mxu0 %v880_v36 }
  0x16   :  { %813 = vmatpush3.bf16.msra.mxu1 %v874_v25  ;;  %842 = vmatprep.subr.bf16.mxu0 %v881_v37 }
  0x17   :  { %814 = vmatprep.subr.bf16.mxu1 %v875_v28 }
  0x19   :  { %843 = vmatpush3.bf16.msra.mxu0 %v881_v37 }
  0x1a   :  { %797 = vmatmul.mubr.msk.bf16.gmra.mrb[8].mxu0 %vm74_vm0, %v48_v26  ;;  %815 = vmatpush3.bf16.msra.mxu1 %v875_v28 }
  0x1b   :  { %800 = vmatprep.mubr.msk.bf16.mxu0 %vm74_vm0, %v49_v27  ;;  %816 = vmatprep.subr.bf16.mxu1 %v876_v32 }
  0x1c   :  { %844 = vmatprep.subr.bf16.mxu0 %v882_v38 }
  0x1d   :  { %845 = vmatpush3.bf16.msra.mxu0 %v882_v38 }
  0x1e   :  { %817 = vmatpush3.bf16.msra.mxu1 %v876_v32  ;;  %846 = vmatprep.subr.bf16.mxu0 %v883_v39 }
  0x1f   :  { %818 = vmatprep.subr.bf16.mxu1 %v877_v33 }
  0x21   :  { %847 = vmatpush3.bf16.msra.mxu0 %v883_v39 }
  0x22   :  { %801 = vmatmul.mubr.msk.bf16.gmra.mrb[12].mxu0 %vm74_vm0, %v50_v31  ;;  %819 = vmatpush3.bf16.msra.mxu1 %v877_v33  ;;  %v884_v33 = vld [vmem:[%s1194_s5 + $0x30] sm:$0xff]  }
  0x23   :  { %848 = vmatprep.subr.bf16.mxu0 %v884_v33 }
  0x25   :  { %849 = vmatpush3.bf16.msra.mxu0 %v884_v33 }
  0x26   :  { %850 = vmatprep.subr.bf16.mxu0 %v885_v34 }
  0x29   :  { %851 = vmatpush3.bf16.msra.mxu0 %v885_v34 }
  0xdd   :  { %v790_v41 = vpop.f32.mrb[0].mxu0 }
  0xde   :  { %v142_v42 = vadd.f32 %v790_v41, %v697_v40  ;;  %v133_v43 = vpop.f32.mrb[1].mxu0 }
  0xdf   :  { %v134_v44 = vadd.f32 %v697_v40, %v133_v43  ;;  %v791_v45 = vpop.f32.mrb[2].mxu0 }
  0xe0   :  { %v145_v46 = vadd.f32 %v791_v45, %v697_v40  ;;  %v136_v47 = vpop.f32.mrb[3].mxu0  ;;  %v198_v49 = vmax.f32 %v142_v42, 0.0 }
  0xe1   :  { %v137_v48 = vadd.f32 %v697_v40, %v136_v47  ;;  %v196_v51 = vmax.f32 %v134_v44, 0.0 }
  0xe2   :  { %v199_v50 = vmax.f32 %v145_v46, 0.0 }
  0xe3   :  { %v197_v52 = vmax.f32 %v137_v48, 0.0 }
  0xe4   :  { %v213_v53 = vpack.c.bf16 %v199_v50, %v198_v49 }
  0xe5   :  { %v794_v54 = vpop.f32.mrb[4].mxu0  ;;  %v212_v55 = vpack.c.bf16 %v197_v52, %v196_v51 }
  0xe6   :  { %v158_v56 = vadd.f32 %v794_v54, %v697_v40  ;;  %v149_v57 = vpop.f32.mrb[5].mxu0 }
  0xe7   :  { %v150_v58 = vadd.f32 %v697_v40, %v149_v57  ;;  %v795_v59 = vpop.f32.mrb[6].mxu0  ;;  %820 = vmatprep.mubr.bf16.mxu1 %v212_v55 }
  0xe8   :  { %v161_v60 = vadd.f32 %v795_v59, %v697_v40  ;;  %v152_v61 = vpop.f32.mrb[7].mxu0  ;;  %821 = vmatmul.mubr.bf16.vlgmr.msra.gmra.mrb[0].mxu1 %v213_v53  ;;  %v202_v63 = vmax.f32 %v158_v56, 0.0 }
  0xe9   :  { %v153_v62 = vadd.f32 %v697_v40, %v152_v61  ;;  %v200_v1 = vmax.f32 %v150_v58, 0.0 }
  0xea   :  { %v203_v0 = vmax.f32 %v161_v60, 0.0 }
  0xeb   :  { %v201_v2 = vmax.f32 %v153_v62, 0.0 }
  0xec   :  { %v215_v3 = vpack.c.bf16 %v203_v0, %v202_v63 }
  0xed   :  { %v214_v4 = vpack.c.bf16 %v201_v2, %v200_v1  ;;  %v798_v5 = vpop.f32.mrb[8].mxu0 }
  0xee   :  { %v174_v6 = vadd.f32 %v798_v5, %v697_v40  ;;  %v165_v7 = vpop.f32.mrb[9].mxu0 }
  0xef   :  { %v166_v8 = vadd.f32 %v697_v40, %v165_v7  ;;  %v799_v9 = vpop.f32.mrb[10].mxu0  ;;  %824 = vmatprep.mubr.bf16.mxu1 %v214_v4 }
  0xf0   :  { %v177_v10 = vadd.f32 %v799_v9, %v697_v40  ;;  %v168_v11 = vpop.f32.mrb[11].mxu0  ;;  %825 = vmatmul.mubr.bf16.gmra.mrb[4].mxu1 %v215_v3  ;;  %v206_v13 = vmax.f32 %v174_v6, 0.0 }
  0xf1   :  { %v169_v12 = vadd.f32 %v697_v40, %v168_v11  ;;  %v204_v15 = vmax.f32 %v166_v8, 0.0 }
  0xf2   :  { %v207_v14 = vmax.f32 %v177_v10, 0.0 }
  0xf3   :  { %v205_v16 = vmax.f32 %v169_v12, 0.0 }
  0xf4   :  { %v217_v17 = vpack.c.bf16 %v207_v14, %v206_v13 }
  0xf5   :  { %v216_v18 = vpack.c.bf16 %v205_v16, %v204_v15  ;;  %v802_v19 = vpop.f32.mrb[12].mxu0 }
  0xf6   :  { %v190_v20 = vadd.f32 %v802_v19, %v697_v40  ;;  %v181_v21 = vpop.f32.mrb[13].mxu0 }
  0xf7   :  { %v182_v22 = vadd.f32 %v697_v40, %v181_v21  ;;  %v803_v23 = vpop.f32.mrb[14].mxu0  ;;  %828 = vmatprep.mubr.bf16.mxu1 %v216_v18 }
  0xf8   :  { %v193_v24 = vadd.f32 %v803_v23, %v697_v40  ;;  %v184_v25 = vpop.f32.mrb[15].mxu0  ;;  %829 = vmatmul.mubr.bf16.gmra.mrb[8].mxu1 %v217_v17  ;;  %v210_v27 = vmax.f32 %v190_v20, 0.0 }
  0xf9   :  { %v185_v26 = vadd.f32 %v697_v40, %v184_v25  ;;  %v208_v29 = vmax.f32 %v182_v22, 0.0 }
  0xfa   :  { %v211_v28 = vmax.f32 %v193_v24, 0.0 }
  0xfb   :  { %v209_v30 = vmax.f32 %v185_v26, 0.0 }
  0xfc   :  { %v219_v31 = vpack.c.bf16 %v211_v28, %v210_v27  ;;  %v1109_v28 = vld [vmem:[%s1197_s6] ss:$0 sm:$0xff] }
  0xfd   :  { %v218_v32 = vpack.c.bf16 %v209_v30, %v208_v29 }
  0xff   :  { %832 = vmatprep.mubr.bf16.mxu1 %v218_v32 }
 0x100   :  { %833 = vmatmul.mubr.bf16.gmra.mrb[12].mxu1 %v219_v31 }
 0x1bb   :  { %v822_v36 = vpop.f32.mrb[0].mxu1 }
 0x1bc   :  { %v334_v37 = vadd.f32 %v822_v36, %v708_v35  ;;  %v325_v38 = vpop.f32.mrb[1].mxu1 }
 0x1bd   :  { %v326_v39 = vadd.f32 %v708_v35, %v325_v38  ;;  %v823_v40 = vpop.f32.mrb[2].mxu1 }
 0x1be   :  { %v337_v41 = vadd.f32 %v823_v40, %v708_v35  ;;  %v328_v42 = vpop.f32.mrb[3].mxu1  ;;  %v390_v44 = vmax.f32 %v334_v37, 0.0 }
 0x1bf   :  { %v329_v43 = vadd.f32 %v708_v35, %v328_v42  ;;  %v388_v46 = vmax.f32 %v326_v39, 0.0 }
 0x1c0   :  { %v391_v45 = vmax.f32 %v337_v41, 0.0 }
 0x1c1   :  { %v389_v47 = vmax.f32 %v329_v43, 0.0 }
 0x1c2   :  { %v405_v48 = vpack.c.bf16 %v391_v45, %v390_v44 }
 0x1c3   :  { %v404_v49 = vpack.c.bf16 %v389_v47, %v388_v46  ;;  %v826_v50 = vpop.f32.mrb[4].mxu1 }
 0x1c4   :  { %v350_v51 = vadd.f32 %v826_v50, %v708_v35  ;;  %v341_v52 = vpop.f32.mrb[5].mxu1 }
 0x1c5   :  { %v342_v53 = vadd.f32 %v708_v35, %v341_v52  ;;  %v827_v54 = vpop.f32.mrb[6].mxu1  ;;  %852 = vmatprep.mubr.bf16.mxu0 %v404_v49 }
 0x1c6   :  { %v353_v55 = vadd.f32 %v827_v54, %v708_v35  ;;  %v344_v56 = vpop.f32.mrb[7].mxu1  ;;  %853 = vmatmul.mubr.bf16.vlgmr.msra.gmra.mrb[16].mxu0 %v405_v48  ;;  %v394_v58 = vmax.f32 %v350_v51, 0.0 }
 0x1c7   :  { %v345_v57 = vadd.f32 %v708_v35, %v344_v56  ;;  %v392_v60 = vmax.f32 %v342_v53, 0.0 }
 0x1c8   :  { %v395_v59 = vmax.f32 %v353_v55, 0.0 }
 0x1c9   :  { %v393_v61 = vmax.f32 %v345_v57, 0.0 }
 0x1ca   :  { %v407_v62 = vpack.c.bf16 %v395_v59, %v394_v58 }
 0x1cb   :  { %v406_v63 = vpack.c.bf16 %v393_v61, %v392_v60  ;;  %v830_v0 = vpop.f32.mrb[8].mxu1 }
 0x1cc   :  { %v366_v1 = vadd.f32 %v830_v0, %v708_v35  ;;  %v357_v2 = vpop.f32.mrb[9].mxu1 }
 0x1cd   :  { %v358_v3 = vadd.f32 %v708_v35, %v357_v2  ;;  %v831_v4 = vpop.f32.mrb[10].mxu1  ;;  %856 = vmatprep.mubr.bf16.mxu0 %v406_v63 }
 0x1ce   :  { %v369_v5 = vadd.f32 %v831_v4, %v708_v35  ;;  %v360_v6 = vpop.f32.mrb[11].mxu1  ;;  %857 = vmatmul.mubr.bf16.gmra.mrb[20].mxu0 %v407_v62  ;;  %v398_v8 = vmax.f32 %v366_v1, 0.0 }
 0x1cf   :  { %v361_v7 = vadd.f32 %v708_v35, %v360_v6  ;;  %v396_v10 = vmax.f32 %v358_v3, 0.0 }
 0x1d0   :  { %v399_v9 = vmax.f32 %v369_v5, 0.0 }
 0x1d1   :  { %v397_v11 = vmax.f32 %v361_v7, 0.0 }
 0x1d2   :  { %v409_v12 = vpack.c.bf16 %v399_v9, %v398_v8 }
 0x1d3   :  { %v408_v13 = vpack.c.bf16 %v397_v11, %v396_v10  ;;  %v834_v14 = vpop.f32.mrb[12].mxu1 }
 0x1d4   :  { %v382_v15 = vadd.f32 %v834_v14, %v708_v35  ;;  %v373_v16 = vpop.f32.mrb[13].mxu1 }
 0x1d5   :  { %v374_v17 = vadd.f32 %v708_v35, %v373_v16  ;;  %v835_v18 = vpop.f32.mrb[14].mxu1  ;;  %860 = vmatprep.mubr.bf16.mxu0 %v408_v13 }
 0x1d6   :  { %v385_v19 = vadd.f32 %v835_v18, %v708_v35  ;;  %v376_v20 = vpop.f32.mrb[15].mxu1  ;;  %861 = vmatmul.mubr.bf16.gmra.mrb[24].mxu0 %v409_v12  ;;  %v402_v22 = vmax.f32 %v382_v15, 0.0 }
 0x1d7   :  { %v377_v21 = vadd.f32 %v708_v35, %v376_v20  ;;  %v400_v24 = vmax.f32 %v374_v17, 0.0 }
 0x1d8   :  { %v403_v23 = vmax.f32 %v385_v19, 0.0 }
 0x1d9   :  { %v401_v25 = vmax.f32 %v377_v21, 0.0 }
 0x1da   :  { %v411_v26 = vpack.c.bf16 %v403_v23, %v402_v22 }
 0x1db   :  { %v410_v27 = vpack.c.bf16 %v401_v25, %v400_v24 }
 0x1dd   :  { %864 = vmatprep.mubr.bf16.mxu0 %v410_v27 }
 0x1de   :  { %865 = vmatmul.mubr.bf16.gmra.mrb[28].mxu0 %v411_v26 }
 0x299   :  { %v854_v29 = vpop.f32.mrb[16].mxu0 }
 0x29a   :  { %v526_v30 = vadd.f32 %v854_v29, %v1109_v28  ;;  %v517_v31 = vpop.f32.mrb[17].mxu0 }
 0x29b   :  { %v518_v32 = vadd.f32 %v1109_v28, %v517_v31  ;;  %v855_v33 = vpop.f32.mrb[18].mxu0 }
 0x29c   :  { %v728_v34 = vmul.f32 -1.442695, %v526_v30  ;;  %v529_v35 = vadd.f32 %v855_v33, %v1109_v28  ;;  %v520_v36 = vpop.f32.mrb[19].mxu0 }
 0x29d   :  { %v726_v37 = vmul.f32 -1.442695, %v518_v32  ;;  %v521_v38 = vadd.f32 %v1109_v28, %v520_v36 }
 0x29e   :  { %886 = vpow2.f32 %v728_v34  ;;  %v729_v39 = vmul.f32 -1.442695, %v529_v35 }
 0x29f   :  { %888 = vpow2.f32 %v726_v37  ;;  %v727_v40 = vmul.f32 -1.442695, %v521_v38 }
 0x2a0   :  { %890 = vpow2.f32 %v729_v39 }
 0x2a1   :  { %892 = vpow2.f32 %v727_v40  ;;  %v858_v41 = vpop.f32.mrb[20].mxu0 }
 0x2a2   :  { %v542_v42 = vadd.f32 %v858_v41, %v1109_v28  ;;  %v533_v43 = vpop.f32.mrb[21].mxu0 }
 0x2a3   :  { %v534_v44 = vadd.f32 %v1109_v28, %v533_v43  ;;  %v859_v45 = vpop.f32.mrb[22].mxu0 }
 0x2a4   :  { %v732_v46 = vmul.f32 -1.442695, %v542_v42  ;;  %v545_v47 = vadd.f32 %v859_v45, %v1109_v28  ;;  %v536_v48 = vpop.f32.mrb[23].mxu0 }
 0x2a5   :  { %v730_v49 = vmul.f32 -1.442695, %v534_v44  ;;  %v537_v50 = vadd.f32 %v1109_v28, %v536_v48 }
 0x2a6   :  { %894 = vpow2.f32 %v732_v46  ;;  %v733_v51 = vmul.f32 -1.442695, %v545_v47 }
 0x2a7   :  { %896 = vpow2.f32 %v730_v49  ;;  %v731_v52 = vmul.f32 -1.442695, %v537_v50 }
 0x2a8   :  { %v887_v53 = vpop.eup %886  ;;  %898 = vpow2.f32 %v733_v51 }
 0x2a9   :  { %v889_v54 = vpop.eup %888  ;;  %v630_v55 = vadd.f32 1.0, %v887_v53  ;;  %900 = vpow2.f32 %v731_v52  ;;  %v862_v56 = vpop.f32.mrb[24].mxu0 }
 0x2aa   :  { %v891_v57 = vpop.eup %890  ;;  %v628_v58 = vadd.f32 1.0, %v889_v54  ;;  %v558_v59 = vadd.f32 %v862_v56, %v1109_v28  ;;  %v549_v60 = vpop.f32.mrb[25].mxu0 }
 0x2ab   :  { %v893_v61 = vpop.eup %892  ;;  %902 = vrcp.f32 %v630_v55  ;;  %v631_v62 = vadd.f32 1.0, %v891_v57  ;;  %v550_v63 = vadd.f32 %v1109_v28, %v549_v60  ;;  %v863_v0 = vpop.f32.mrb[26].mxu0 }
 0x2ac   :  { %904 = vrcp.f32 %v628_v58  ;;  %v629_v1 = vadd.f32 1.0, %v893_v61  ;;  %v736_v2 = vmul.f32 -1.442695, %v558_v59  ;;  %v561_v3 = vadd.f32 %v863_v0, %v1109_v28  ;;  %v552_v4 = vpop.f32.mrb[27].mxu0 }
 0x2ad   :  { %906 = vrcp.f32 %v631_v62  ;;  %v734_v5 = vmul.f32 -1.442695, %v550_v63  ;;  %v553_v6 = vadd.f32 %v1109_v28, %v552_v4 }
 0x2ae   :  { %908 = vrcp.f32 %v629_v1  ;;  %v737_v7 = vmul.f32 -1.442695, %v561_v3 }
 0x2af   :  { %910 = vpow2.f32 %v736_v2  ;;  %v735_v8 = vmul.f32 -1.442695, %v553_v6 }
 0x2b0   :  { %v895_v9 = vpop.eup %894  ;;  %912 = vpow2.f32 %v734_v5 }
 0x2b1   :  { %v897_v10 = vpop.eup %896  ;;  %v634_v11 = vadd.f32 1.0, %v895_v9  ;;  %914 = vpow2.f32 %v737_v7  ;;  %v866_v12 = vpop.f32.mrb[28].mxu0 }
 0x2b2   :  { %v899_v13 = vpop.eup %898  ;;  %v632_v14 = vadd.f32 1.0, %v897_v10  ;;  %916 = vpow2.f32 %v735_v8  ;;  %v574_v15 = vadd.f32 %v866_v12, %v1109_v28  ;;  %v565_v16 = vpop.f32.mrb[29].mxu0 }
 0x2b3   :  { %v901_v17 = vpop.eup %900  ;;  %918 = vrcp.f32 %v634_v11  ;;  %v635_v18 = vadd.f32 1.0, %v899_v13  ;;  %v566_v19 = vadd.f32 %v1109_v28, %v565_v16  ;;  %v867_v20 = vpop.f32.mrb[30].mxu0 }
 0x2b4   :  { %920 = vrcp.f32 %v632_v14  ;;  %v633_v21 = vadd.f32 1.0, %v901_v17  ;;  %v740_v22 = vmul.f32 -1.442695, %v574_v15  ;;  %v577_v23 = vadd.f32 %v867_v20, %v1109_v28  ;;  %v568_v24 = vpop.f32.mrb[31].mxu0 }
 0x2b5   :  { %v903_v25 = vpop.eup %902  ;;  %922 = vrcp.f32 %v635_v18  ;;  %v738_v26 = vmul.f32 -1.442695, %v566_v19  ;;  %v569_v27 = vadd.f32 %v1109_v28, %v568_v24 }
 0x2b6   :  { %v905_v29 = vpop.eup %904  ;;  %679 = vst.msk [vmem:[%s1198_s7 + $0x10] sm:$0xff] %vm676_vm1, %v903_v25  ;;  %924 = vrcp.f32 %v633_v21  ;;  %v741_v30 = vmul.f32 -1.442695, %v577_v23 }
 0x2b7   :  { %v907_v31 = vpop.eup %906  ;;  %677 = vst.msk [vmem:[%s1198_s7] sm:$0xff] %vm676_vm1, %v905_v29  ;;  %926 = vpow2.f32 %v740_v22  ;;  %v739_v32 = vmul.f32 -1.442695, %v569_v27 }
 0x2b8   :  { %v909_v33 = vpop.eup %908  ;;  %680 = vst.msk [vmem:[%s1198_s7 + $0x18] sm:$0xff] %vm676_vm1, %v907_v31  ;;  %928 = vpow2.f32 %v738_v26 }
 0x2b9   :  { %v911_v28 = vpop.eup %910  ;;  %678 = vst.msk [vmem:[%s1198_s7 + $0x8] sm:$0xff] %vm676_vm1, %v909_v33  ;;  %930 = vpow2.f32 %v741_v30 }
 0x2ba   :  { %v913_v34 = vpop.eup %912  ;;  %v638_v35 = vadd.f32 1.0, %v911_v28  ;;  %932 = vpow2.f32 %v739_v32 }
 0x2bb   :  { %v915_v36 = vpop.eup %914  ;;  %v636_v37 = vadd.f32 1.0, %v913_v34 }
 0x2bc   :  { %v917_v38 = vpop.eup %916  ;;  %934 = vrcp.f32 %v638_v35  ;;  %v639_v39 = vadd.f32 1.0, %v915_v36 }
 0x2bd   :  { %v919_v40 = vpop.eup %918  ;;  %936 = vrcp.f32 %v636_v37  ;;  %v637_v41 = vadd.f32 1.0, %v917_v38 }
 0x2be   :  { %v921_v42 = vpop.eup %920  ;;  %683 = vst.msk [vmem:[%s1198_s7 + $0x30] sm:$0xff] %vm676_vm1, %v919_v40  ;;  %938 = vrcp.f32 %v639_v39 }
 0x2bf   :  { %v923_v43 = vpop.eup %922  ;;  %681 = vst.msk [vmem:[%s1198_s7 + $0x20] sm:$0xff] %vm676_vm1, %v921_v42  ;;  %940 = vrcp.f32 %v637_v41 }
 0x2c0   :  { %v925_v44 = vpop.eup %924  ;;  %684 = vst.msk [vmem:[%s1198_s7 + $0x38] sm:$0xff] %vm676_vm1, %v923_v43 }
 0x2c1   :  { %v927_v45 = vpop.eup %926  ;;  %682 = vst.msk [vmem:[%s1198_s7 + $0x28] sm:$0xff] %vm676_vm1, %v925_v44 }
 0x2c2   :  { %v929_v46 = vpop.eup %928  ;;  %v642_v47 = vadd.f32 1.0, %v927_v45 }
 0x2c3   :  { %v931_v48 = vpop.eup %930  ;;  %v640_v49 = vadd.f32 1.0, %v929_v46 }
 0x2c4   :  { %v933_v50 = vpop.eup %932  ;;  %942 = vrcp.f32 %v642_v47  ;;  %v643_v51 = vadd.f32 1.0, %v931_v48 }
 0x2c5   :  { %944 = vrcp.f32 %v640_v49  ;;  %v641_v52 = vadd.f32 1.0, %v933_v50 }
 0x2c6   :  { %v935_v53 = vpop.eup %934  ;;  %946 = vrcp.f32 %v643_v51 }
 0x2c7   :  { %v937_v54 = vpop.eup %936  ;;  %687 = vst.msk [vmem:[%s1198_s7 + $0x50] sm:$0xff] %vm676_vm1, %v935_v53  ;;  %948 = vrcp.f32 %v641_v52 }
 0x2c8   :  { %v939_v55 = vpop.eup %938  ;;  %685 = vst.msk [vmem:[%s1198_s7 + $0x40] sm:$0xff] %vm676_vm1, %v937_v54 }
 0x2c9   :  { %v941_v56 = vpop.eup %940  ;;  %688 = vst.msk [vmem:[%s1198_s7 + $0x58] sm:$0xff] %vm676_vm1, %v939_v55 }
 0x2ca   :  { %686 = vst.msk [vmem:[%s1198_s7 + $0x48] sm:$0xff] %vm676_vm1, %v941_v56 }
 0x2ce   :  { %v943_v57 = vpop.eup %942 }
 0x2cf   :  { %v945_v58 = vpop.eup %944  ;;  %691 = vst.msk [vmem:[%s1198_s7 + $0x70] sm:$0xff] %vm676_vm1, %v943_v57 }
 0x2d0   :  { %v947_v59 = vpop.eup %946  ;;  %689 = vst.msk [vmem:[%s1198_s7 + $0x60] sm:$0xff] %vm676_vm1, %v945_v58 }
 0x2d1   :  { %v949_v60 = vpop.eup %948  ;;  %692 = vst.msk [vmem:[%s1198_s7 + $0x78] sm:$0xff] %vm676_vm1, %v947_v59 }
 0x2d2   :  { %690 = vst.msk [vmem:[%s1198_s7 + $0x68] sm:$0xff] %vm676_vm1, %v949_v60 }

</bundles_post_ra>
